<compile_context>
chip_gen: v7x
topology: tpu7x:2x2x1
jax: 0.10.0
libtpu: 0.0.40
codegen_flags: <defaults>
</compile_context>

<pallas_src>
import numpy as np
import jax
import jax.numpy as jnp
from jax.experimental import pallas as pl
from jax.experimental.pallas import tpu as pltpu

LANE = 128        # TPU lane width (last vreg dim)
SUBLANE = 8       # TPU sublane count
OUT_FEATURES = 2  # SiameseNet FC output size
TR_MAX = 512      # max rows per grid step (bounds VMEM, keeps DMAs large)


def _round_up(x, m):
    return -(-x // m) * m


def _vmem_caps():
    """(vmem_limit_bytes to request, per-step block budget in bytes)."""
    try:
        cap = pltpu.get_tpu_info().vmem_capacity_bytes   # 64 MiB v7x, 128 MiB v5e/v6e
    except Exception:
        cap = 64 * 1024 * 1024                           # conservative fallback (v7x)
    scoped = cap // 2                                    # raise v5e's 16 MiB default
    budget = int(scoped * 0.6)                           # headroom for compiler scratch
    return scoped, budget


def _k_tiling(E, vmem_budget):
    """Pick (tk, padded_E, nk).  Prefer a single K block; fall back to wide K tiles."""
    e_lane = _round_up(E, LANE)

    def footprint(tk):
        return (2 * 2 * TR_MAX * tk * 4      # f1/f2 blocks, double-buffered, f32
                + 2 * tk * LANE * 2          # weight block, double-buffered, bf16
                + 2 * TR_MAX * LANE * 4      # output block, f32
                + 2 * LANE * 4)              # bias

    if footprint(e_lane) <= vmem_budget:
        return e_lane, e_lane, 1
    for tk in (2048, 1024, 512):
        if footprint(tk) <= vmem_budget:
            ep = _round_up(e_lane, tk)
            return tk, ep, ep // tk
    ep = _round_up(e_lane, 512)
    return 512, ep, ep // 512


# ---------------------------------------------------------------------------
# Kernels: fused f32 |f1 - f2| (VPU)  ->  bf16 matmul (MXU, f32 acc)  ->  + bias
# ---------------------------------------------------------------------------
def _siamese_kernel_single_k(f1_ref, f2_ref, w_ref, b_ref, o_ref):
    # Single K block: one direct store, no zero-init / accumulate passes.
    d = jnp.abs(f1_ref[...] - f2_ref[...])                       # f32 on the VPU
    o_ref[...] = (jnp.dot(d.astype(jnp.bfloat16), w_ref[...],
                          preferred_element_type=jnp.float32)    # MXU, f32 acc
                  + b_ref[...])


def _siamese_kernel_multi_k(f1_ref, f2_ref, w_ref, b_ref, o_ref):
    k = pl.program_id(1)

    @pl.when(k == 0)
    def _():
        o_ref[...] = jnp.zeros_like(o_ref)

    d = jnp.abs(f1_ref[...] - f2_ref[...])                       # f32 on the VPU
    o_ref[...] += jnp.dot(d.astype(jnp.bfloat16), w_ref[...],
                          preferred_element_type=jnp.float32)

    @pl.when(k == pl.num_programs(1) - 1)
    def _():
        o_ref[...] += b_ref[...]


# ---------------------------------------------------------------------------
# One-time parameter packing (hoisted out of the forward path).
# ---------------------------------------------------------------------------
def prepare_params(w, b):
    """Pack torch-layout Linear params: w (2, E) f32, b (2,) f32 ->
       wp (E_pad, 128) bf16 (lane-dense W^T), bp (1, 128) f32."""
    out_f, E = w.shape
    assert out_f <= LANE
    _, budget = _vmem_caps()
    _, ep, _ = _k_tiling(E, budget)
    wp = jnp.zeros((ep, LANE), jnp.bfloat16).at[:E, :out_f].set(w.T.astype(jnp.bfloat16))
    bp = jnp.zeros((1, LANE), jnp.float32).at[0, :out_f].set(b.astype(jnp.float32))
    return wp, bp


# ---------------------------------------------------------------------------
# Forward: |f1 - f2| @ W^T + b   (f1, f2: (N, E) f32; returns (N, 2) f32)
# ---------------------------------------------------------------------------
def siamese_forward(f1, f2, wp, bp):
    N, E = f1.shape
    scoped_vmem, budget = _vmem_caps()
    tk, ep, nk = _k_tiling(E, budget)
    assert wp.shape == (ep, LANE), (wp.shape, ep)

    # Row (batch) tiling: single full-dim block for small N, fixed 512-row tile else.
    if N <= TR_MAX:
        tr, rows = N, N
    else:
        tr, rows = TR_MAX, _round_up(N, TR_MAX)
    nr = rows // tr

    # Pad inputs only when shapes actually require it (common case: no padding op).
    if rows != N or ep != E:
        f1 = jnp.zeros((rows, ep), f1.dtype).at[:N, :E].set(f1)
        f2 = jnp.zeros((rows, ep), f2.dtype).at[:N, :E].set(f2)

    if nk == 1:
        kernel = _siamese_kernel_single_k
        grid = (nr,)
        in_specs = [
            pl.BlockSpec((tr, ep), lambda r: (r, 0)),      # f1 (f32)
            pl.BlockSpec((tr, ep), lambda r: (r, 0)),      # f2 (f32)
            pl.BlockSpec((ep, LANE), lambda r: (0, 0)),    # W^T (bf16, lane-padded)
            pl.BlockSpec((1, LANE), lambda r: (0, 0)),     # bias (f32, lane-padded)
        ]
        out_specs = pl.BlockSpec((tr, LANE), lambda r: (r, 0))
        dims = ("parallel",)
    else:
        kernel = _siamese_kernel_multi_k
        grid = (nr, nk)
        in_specs = [
            pl.BlockSpec((tr, tk), lambda r, k: (r, k)),
            pl.BlockSpec((tr, tk), lambda r, k: (r, k)),
            pl.BlockSpec((tk, LANE), lambda r, k: (k, 0)),
            pl.BlockSpec((1, LANE), lambda r, k: (0, 0)),
        ]
        # K-constant output index_map -> o_ref is resident across K (accumulator).
        out_specs = pl.BlockSpec((tr, LANE), lambda r, k: (r, 0))
        dims = ("parallel", "arbitrary")

    out = pl.pallas_call(
        kernel,
        out_shape=jax.ShapeDtypeStruct((rows, LANE), jnp.float32),
        grid_spec=pltpu.PrefetchScalarGridSpec(
            num_scalar_prefetch=0,
            grid=grid,
            in_specs=in_specs,
            out_specs=out_specs,
        ),
        compiler_params=pltpu.CompilerParams(
            dimension_semantics=dims,
            vmem_limit_bytes=scoped_vmem,
        ),
    )(f1, f2, wp, bp)

    return out[:N, :OUT_FEATURES]


# Pure-JAX reference (f32) for the numerical self-check.
def siamese_forward_ref(f1, f2, w, b):
    return jnp.abs(f1 - f2) @ w.T + b[None, :]


# ---------------------------------------------------------------------------
# Deterministic parameter init matching torch.nn.Linear defaults.
# ---------------------------------------------------------------------------
def init_params(key, embedding_size):
    k1, k2 = jax.random.split(key)
    bnd = 1.0 / np.sqrt(embedding_size)
    w = jax.random.uniform(k1, (OUT_FEATURES, embedding_size), jnp.float32, -bnd, bnd)
    b = jax.random.uniform(k2, (OUT_FEATURES,), jnp.float32, -bnd, bnd)
    return w, b


if __name__ == "__main__":
    key = jax.random.PRNGKey(0)
    k1, k2, kp = jax.random.split(key, 3)

    batch = 8
    embedding_size = 256   # encoder_embeddingsize

    f1 = jax.random.normal(k1, (batch, embedding_size), jnp.float32)
    f2 = jax.random.normal(k2, (batch, embedding_size), jnp.float32)
    w, b = init_params(kp, embedding_size)

    # One-time packing of the Linear params (hoisted out of the forward path).
    wp, bp = prepare_params(w, b)

    fwd = jax.jit(siamese_forward)
    out = jax.block_until_ready(fwd(f1, f2, wp, bp))
    assert out.shape == (batch, OUT_FEATURES), out.shape

    ref = jax.block_until_ready(jax.jit(siamese_forward_ref)(f1, f2, w, b))
    np.testing.assert_allclose(np.asarray(out), np.asarray(ref), rtol=2e-2, atol=2e-2)

    print("KERNEL_OK")
</pallas_src>

<mosaic_0001>
module attributes {stable_mosaic.version = 11 : i64} {
  func.func @_siamese_kernel_single_k(%arg0: i32, %arg1: memref<8x256xf32, #tpu.memory_space<vmem>>, %arg2: memref<8x256xf32, #tpu.memory_space<vmem>>, %arg3: memref<256x128xbf16, #tpu.memory_space<vmem>>, %arg4: memref<1x128xf32, #tpu.memory_space<vmem>>, %arg5: memref<8x128xf32, #tpu.memory_space<vmem>>) attributes {dimension_semantics = [#tpu.dimension_semantics<parallel>], iteration_bounds = array<i64: 1>, scalar_prefetch = 0 : i64, scratch_operands = 0 : i64, tpu.core_type = #tpu.core_type<tc>, window_params = [{transform_indices = @transform_0, window_bounds = array<i64: 8, 256>}, {transform_indices = @transform_1, window_bounds = array<i64: 8, 256>}, {pipeline_mode = #tpu.pipeline_mode<synchronous>, transform_indices = @transform_2, window_bounds = array<i64: 256, 128>}, {pipeline_mode = #tpu.pipeline_mode<synchronous>, transform_indices = @transform_3, window_bounds = array<i64: 1, 128>}, {transform_indices = @transform_4, window_bounds = array<i64: 8, 128>}]} {
    %c0 = arith.constant 0 : index
    %c0_0 = arith.constant 0 : index
    %0 = vector.load %arg1[%c0, %c0_0] : memref<8x256xf32, #tpu.memory_space<vmem>>, vector<8x256xf32>
    %c0_1 = arith.constant 0 : index
    %c0_2 = arith.constant 0 : index
    %1 = vector.load %arg2[%c0_1, %c0_2] : memref<8x256xf32, #tpu.memory_space<vmem>>, vector<8x256xf32>
    %2 = arith.subf %0, %1 : vector<8x256xf32>
    %3 = math.absf %2 : vector<8x256xf32>
    %4 = arith.truncf %3 : vector<8x256xf32> to vector<8x256xbf16>
    %c0_3 = arith.constant 0 : index
    %c0_4 = arith.constant 0 : index
    %5 = vector.load %arg3[%c0_3, %c0_4] : memref<256x128xbf16, #tpu.memory_space<vmem>>, vector<256x128xbf16>
    %cst = arith.constant dense<0.000000e+00> : vector<8x128xf32>
    %6 = tpu.matmul %4, %5, %cst {dimension_numbers = #tpu.dot_dimension_numbers<[1], [0], [0], [1], [0, 0, 1, 1], [], []>} : vector<8x256xbf16>, vector<256x128xbf16>, vector<8x128xf32> -> vector<8x128xf32>
    %c0_5 = arith.constant 0 : index
    %c0_6 = arith.constant 0 : index
    %7 = vector.load %arg4[%c0_5, %c0_6] : memref<1x128xf32, #tpu.memory_space<vmem>>, vector<1x128xf32>
    %8 = vector.broadcast %7 : vector<1x128xf32> to vector<8x128xf32>
    %9 = arith.addf %6, %8 : vector<8x128xf32>
    %c0_7 = arith.constant 0 : index
    %c0_8 = arith.constant 0 : index
    %10 = vector.load %arg5[%c0_7, %c0_8] : memref<8x128xf32, #tpu.memory_space<vmem>>, vector<8x128xf32>
    tpu.vector_store %arg5[%c0_7, %c0_8], %9 {strides = array<i32>} : memref<8x128xf32, #tpu.memory_space<vmem>>, vector<8x128xf32>,
    return
  }
  func.func @transform_0(%arg0: i32) -> (i32, i32) {
    %c0_i32 = arith.constant 0 : i32
    %c0_i32_0 = arith.constant 0 : i32
    return %arg0, %c0_i32 : i32, i32
  }
  func.func @transform_1(%arg0: i32) -> (i32, i32) {
    %c0_i32 = arith.constant 0 : i32
    %c0_i32_0 = arith.constant 0 : i32
    return %arg0, %c0_i32 : i32, i32
  }
  func.func @transform_2(%arg0: i32) -> (i32, i32) {
    %c0_i32 = arith.constant 0 : i32
    %c0_i32_0 = arith.constant 0 : i32
    %c0_i32_1 = arith.constant 0 : i32
    return %c0_i32, %c0_i32_0 : i32, i32
  }
  func.func @transform_3(%arg0: i32) -> (i32, i32) {
    %c0_i32 = arith.constant 0 : i32
    %c0_i32_0 = arith.constant 0 : i32
    %c0_i32_1 = arith.constant 0 : i32
    return %c0_i32, %c0_i32_0 : i32, i32
  }
  func.func @transform_4(%arg0: i32) -> (i32, i32) {
    %c0_i32 = arith.constant 0 : i32
    %c0_i32_0 = arith.constant 0 : i32
    return %arg0, %c0_i32 : i32, i32
  }
}

</mosaic_0001>

<bundles_post_ra>
// kernel: siamese_forward.1
= control target key start
LH: loop header
LB: loop body
LE: loop exit
PB: predicated region body
PF: predicated region fallthrough
CT: control target
= control target key end

     0   :  { %9 = vsyncpa [#allocation3], 0  ;;  %s449_s0 = inlined_call_operand.hbm [shape: f32[8,256], index: 0, kind: input, shape index: {}]   ;;  %s450_s1 = inlined_call_operand.hbm [shape: f32[8,256], index: 1, kind: input, shape index: {}]   ;;  %s451_s2 = inlined_call_operand.hbm [shape: bf16[256,128], index: 2, kind: input, shape index: {}]   ;;  %s452_s3 = inlined_call_operand.vmem [shape: f32[1,128], index: 3, kind: input, shape index: {}]   ;;  %s453_s4 = inlined_call_operand.vmem [shape: f32[8,128], index: 4, kind: output, shape index: {}]  }
   0x1   :  { %10 = vsyncpa [#allocation5], 0  ;;  %s377_s15 = smov [#allocation4]   ;;  %s378_s17 = smov [#allocation2]  }
   0x2   :  { %s27_s16 = sshll.u32 %s377_s15, 4  ;;  %s17_s18 = sshll.u32 %s378_s17, 4  ;;  %s28_s16 = int_to_ptr.vmem [resolvable:$true] %s27_s16  ;;  %s18_s18 = int_to_ptr.vmem [resolvable:$true] %s17_s18 }
   0x3   :  { %s307_s21 = scalar_lea.hbm %s450_s1, 256 }
   0x4   :  { %p308_p0 = scmp.ne.s32.totalorder %s450_s1, %s307_s21  ;;  %p311_p1 = scmp.lt.u32.totalorder %s307_s21, %s450_s1 }
   0x6   :  { %p313_p2 = pnand %p311_p1, %p308_p0 }
   0x8   :  { %316 = shalt.err (!%p313_p2)
}
   0x9   :  { %s317_s26 = scalar_lea.vmem %s28_s16, 256  ;;  %p322_p4 = scmp.lt.s32.totalorder %s28_s16, %s28_s16 }
   0xa   :  { %p318_p3 = scmp.ne.s32.totalorder %s28_s16, %s317_s26  ;;  %p323_p5 = scmp.lt.s32.totalorder %s317_s26, %s317_s26 }
   0xc   :  { %p324_p6 = por %p323_p5, %p322_p4 }
   0xe   :  { %p325_p7 = pnand %p324_p6, %p318_p3 }
  0x10   :  { %328 = shalt.err (!%p325_p7)
}
  0x11   :  { %30 = dma.hbm_to_vmem [thread:$0]  %s450_s1, 256, %s28_s16, [#allocation5]  }
  0x12   :  { %s329_s5 = scalar_lea.hbm %s449_s0, 256 }
  0x13   :  { %p330_p8 = scmp.ne.s32.totalorder %s449_s0, %s329_s5  ;;  %p333_p9 = scmp.lt.u32.totalorder %s329_s5, %s449_s0 }
  0x15   :  { %p335_p10 = pnand %p333_p9, %p330_p8 }
  0x17   :  { %338 = shalt.err (!%p335_p10)
}
  0x18   :  { %s339_s10 = scalar_lea.vmem %s18_s18, 256  ;;  %p344_p12 = scmp.lt.s32.totalorder %s18_s18, %s18_s18 }
  0x19   :  { %p340_p11 = scmp.ne.s32.totalorder %s18_s18, %s339_s10  ;;  %p345_p13 = scmp.lt.s32.totalorder %s339_s10, %s339_s10 }
  0x1b   :  { %p346_p0 = por %p345_p13, %p344_p12 }
  0x1d   :  { %p347_p1 = pnand %p346_p0, %p340_p11 }
  0x1f   :  { %350 = shalt.err (!%p347_p1)
}
  0x20   :  { %20 = dma.hbm_to_vmem [thread:$0]  %s449_s0, 256, %s18_s18, [#allocation3]  }
  0x21   :  { %s379_s12 = smov [#allocation6]   ;;  %s351_s16 = scalar_lea.hbm %s451_s2, 2048 }
  0x22   :  { %s36_s13 = sshll.u32 %s379_s12, 4  ;;  %p352_p2 = scmp.ne.s32.totalorder %s451_s2, %s351_s16  ;;  %s37_s13 = int_to_ptr.vmem [resolvable:$true] %s36_s13 }
  0x23   :  { %p355_p3 = scmp.lt.u32.totalorder %s351_s16, %s451_s2 }
  0x25   :  { %p357_p4 = pnand %p355_p3, %p352_p2 }
  0x27   :  { %360 = shalt.err (!%p357_p4)
}
  0x28   :  { %s361_s22 = scalar_lea.vmem %s37_s13, 2048  ;;  %p366_p6 = scmp.lt.s32.totalorder %s37_s13, %s37_s13 }
  0x29   :  { %p362_p5 = scmp.ne.s32.totalorder %s37_s13, %s361_s22  ;;  %p367_p7 = scmp.lt.s32.totalorder %s361_s22, %s361_s22 }
  0x2b   :  { %p368_p8 = por %p367_p7, %p366_p6 }
  0x2d   :  { %p369_p9 = pnand %p368_p8, %p362_p5 }
  0x2f   :  { %372 = shalt.err (!%p369_p9)
}
  0x30   :  { %s380_s0 = smov 64   ;;  %s381_s18 = smov 4  }
  0x31   :  { %42 = dma.hbm_to_vmem [thread:$0]  %s451_s2, 2048, %s37_s13, [#allocation5], %s380_s0, %s380_s0, %s381_s18  }
  0x32   :  { %373 = dma.done.wait [#allocation3], 256  }
  0x33   :  { %374 = vsyncadd [#allocation3], 4294967040 }
  0x34   :  { %375 = dma.done.wait [#allocation5], 2304  }
  0x35   :  { %376 = vsyncadd [#allocation5], 4294964992  ;;  %v291_v0 = vld [vmem:[#allocation6 + $0x40] sm:$0xff]   ;;  %v293_v2 = vld [vmem:[#allocation6 + $0x48] sm:$0xff]  }
  0x36   :  { %v292_v1 = vld [vmem:[#allocation6] sm:$0xff]   ;;  %264 = vmatprep.subr.bf16.mxu0 %v291_v0  ;;  %v294_v3 = vld [vmem:[#allocation6 + $0x8] sm:$0xff]   ;;  %v295_v4 = vld [vmem:[#allocation6 + $0x50] sm:$0xff]  }
  0x37   :  { %265 = vmatpush3.bf16.msra.mxu0 %v292_v1  ;;  %v296_v5 = vld [vmem:[#allocation6 + $0x10] sm:$0xff]   ;;  %v297_v6 = vld [vmem:[#allocation6 + $0x58] sm:$0xff]   ;;  %v299_v8 = vld [vmem:[#allocation6 + $0x60] sm:$0xff]  }
  0x38   :  { %266 = vmatprep.subr.bf16.mxu0 %v293_v2  ;;  %v298_v7 = vld [vmem:[#allocation6 + $0x18] sm:$0xff]   ;;  %v300_v9 = vld [vmem:[#allocation6 + $0x20] sm:$0xff]   ;;  %v301_v10 = vld [vmem:[#allocation6 + $0x68] sm:$0xff]  }
  0x39   :  { %v56_v11 = vld [vmem:[#allocation2 + $0x8] sm:$0xff]  ;;  %v58_v12 = vld [vmem:[#allocation4 + $0x8] sm:$0xff]  ;;  %v55_v16 = vld [vmem:[#allocation2] sm:$0xff] }
  0x3a   :  { %v60_v13 = vsub.f32 %v56_v11, %v58_v12  ;;  %v302_v14 = vld [vmem:[#allocation6 + $0x28] sm:$0xff]   ;;  %v57_v17 = vld [vmem:[#allocation4] sm:$0xff]  ;;  %v305_v22 = vld [vmem:[#allocation6 + $0x78] sm:$0xff]  }
  0x3b   :  { %267 = vmatpush3.bf16.msra.mxu0 %v294_v3  ;;  %v303_v18 = vld [vmem:[#allocation6 + $0x70] sm:$0xff]   ;;  %v59_v20 = vsub.f32 %v55_v16, %v57_v17  ;;  %v306_v24 = vld [vmem:[#allocation6 + $0x38] sm:$0xff]   ;;  %v247_v27 = vld [vmem:[%s452_s3] ss:$0 sm:$0xff] }
  0x3c   :  { %268 = vmatprep.subr.bf16.mxu0 %v295_v4  ;;  %v62_v15 = vand.u32 2147483647, %v60_v13  ;;  %v304_v21 = vld [vmem:[#allocation6 + $0x30] sm:$0xff]  }
  0x3d   :  { %v61_v23 = vand.u32 2147483647, %v59_v20 }
  0x3e   :  { %v64_v19 = vpack.c.bf16 %v62_v15, %v62_v15 }
  0x3f   :  { %269 = vmatpush3.bf16.msra.mxu0 %v296_v5  ;;  %v63_v25 = vpack.c.bf16 %v61_v23, %v61_v23 }
  0x40   :  { %270 = vmatprep.subr.bf16.mxu0 %v297_v6  ;;  %232 = vmatprep.mubr.bf16.mxu0 %v64_v19 }
  0x43   :  { %271 = vmatpush3.bf16.msra.mxu0 %v298_v7 }
  0x44   :  { %272 = vmatprep.subr.bf16.mxu0 %v299_v8 }
  0x47   :  { %273 = vmatpush3.bf16.msra.mxu0 %v300_v9 }
  0x48   :  { %274 = vmatprep.subr.bf16.mxu0 %v301_v10 }
  0x4b   :  { %275 = vmatpush3.bf16.msra.mxu0 %v302_v14 }
  0x4c   :  { %276 = vmatprep.subr.bf16.mxu0 %v303_v18 }
  0x4f   :  { %277 = vmatpush3.bf16.msra.mxu0 %v304_v21 }
  0x50   :  { %278 = vmatprep.subr.bf16.mxu0 %v305_v22 }
  0x53   :  { %279 = vmatpush3.bf16.msra.mxu0 %v306_v24 }
  0x56   :  { %233 = vmatmul.mubr.bf16.vlgmr.msra.gmra.mrb[0].mxu0 %v63_v25 }
 0x129   :  { %v280_v26 = vpop.f32.mrb[0].mxu0 }
 0x12a   :  { %v281_v28 = vpop.f32.mrb[1].mxu0 }
 0x12b   :  { %v282_v29 = vadd.f32 %v281_v28, %v280_v26  ;;  %v283_v30 = vpop.f32.mrb[2].mxu0 }
 0x12c   :  { %v284_v31 = vpop.f32.mrb[3].mxu0 }
 0x12d   :  { %v235_v32 = vadd.f32 %v282_v29, %v247_v27 }
 0x12f   :  { %240 = vst [vmem:[%s453_s4] sm:$0xff] %v235_v32 }
 0x130   :  { %245 = vsyncpa [#allocation3], 1 }
 0x131   :  { %246 = vsyncpa [#allocation5], 1 }

</bundles_post_ra>
